<compile_context>
chip_gen: v5e
topology: v5e:2x2
jax: 0.10.0
libtpu: 0.0.40
codegen_flags: <defaults>
</compile_context>

<pallas_src>
import math
import functools

import jax
import jax.numpy as jnp
import numpy as np
from jax import lax
from jax.experimental import pallas as pl
from jax.experimental.pallas import tpu as pltpu


def mha_kernel(xq_ref, xk_ref, xv_ref, wqkv_ref, bqkv_ref, wo_ref, bo_ref,
               o_ref, *, scale, heads_per_step, head_dim):
    hg = pl.program_id(2)

    # The f32 output block (same block index across the head-group axis)
    # doubles as the accumulator: zero at the first group, add bias at last.
    @pl.when(hg == 0)
    def _():
        o_ref[...] = jnp.zeros_like(o_ref)

    xq = xq_ref[0]                       # (TQ, E)   bf16
    xk = xk_ref[0]                       # (S,  E)   bf16
    xv = xv_ref[0]                       # (S,  E)   bf16
    wq = wqkv_ref[0, 0]                  # (E, G*Dh) bf16
    wk = wqkv_ref[0, 1]
    wv = wqkv_ref[0, 2]
    bq = bqkv_ref[0, 0]                  # (1, G*Dh) f32
    bk = bqkv_ref[0, 1]
    bv = bqkv_ref[0, 2]
    wo = wo_ref[0]                       # (G*Dh, E) bf16

    # Grouped-head projections: bf16 MXU inputs, f32 accumulation.  The
    # 1/sqrt(Dh) scale is folded into q (O(S*G*Dh) multiply) instead of the
    # O(S^2) score matrix.
    q = (jnp.dot(xq, wq, preferred_element_type=jnp.float32) + bq) * scale
    k = jnp.dot(xk, wk, preferred_element_type=jnp.float32) + bk
    v = jnp.dot(xv, wv, preferred_element_type=jnp.float32) + bv
    q = q.astype(jnp.bfloat16)
    k = k.astype(jnp.bfloat16)
    v = v.astype(jnp.bfloat16)

    # Per-head attention inside the group (small static unrolled loop);
    # softmax statistics stay in f32.
    ctx_parts = []
    for g in range(heads_per_step):
        sl = slice(g * head_dim, (g + 1) * head_dim)
        qh, kh, vh = q[:, sl], k[:, sl], v[:, sl]
        # q @ k^T via dot_general contracting Dh directly (no transpose).
        s = lax.dot_general(qh, kh, (((1,), (1,)), ((), ())),
                            preferred_element_type=jnp.float32)   # (TQ, S)
        s = s - jnp.max(s, axis=-1, keepdims=True)
        p = jnp.exp(s)
        l = jnp.sum(p, axis=-1, keepdims=True)
        ctx = jnp.dot(p.astype(jnp.bfloat16), vh,
                      preferred_element_type=jnp.float32)          # (TQ, Dh)
        # Approximate reciprocal lowers to the EUP vrcp slot (nearly free).
        ctx_parts.append(ctx * pl.reciprocal(l, approx=True))

    ctx_all = (ctx_parts[0] if heads_per_step == 1
               else jnp.concatenate(ctx_parts, axis=-1))           # (TQ, G*Dh)

    # Head "concat" folded into the output projection: one GEMM contracting
    # the whole G*Dh group, accumulated into the lane-dense output block.
    o_ref[0] += jnp.dot(ctx_all.astype(jnp.bfloat16), wo,
                        preferred_element_type=jnp.float32)

    @pl.when(hg == pl.num_programs(2) - 1)
    def _():
        o_ref[0] += bo_ref[...]


def _pick_heads_per_step(num_heads, head_dim):
    """Group heads so the grouped head dim ~fills the 256-wide MXU."""
    g = min(num_heads, max(1, 256 // head_dim))
    while num_heads % g != 0:
        g -= 1
    return g


def _pick_query_tile(seq_len):
    """Largest query tile <= 256 dividing S (full S for short sequences)."""
    if seq_len <= 256:
        return seq_len
    for t in (256, 128, 64, 32, 16, 8):
        if seq_len % t == 0:
            return t
    return seq_len


def multi_head_attention(query, key, value, params, *, num_heads):
    """query/key/value: [B, S, E] float32. params: dict of f32 weights/biases."""
    B, S, E = query.shape
    Dh = E // num_heads
    assert Dh * num_heads == E, "embed_dim must be divisible by num_heads"

    G = _pick_heads_per_step(num_heads, Dh)      # heads per grid step
    HG = num_heads // G                          # number of head groups
    GD = G * Dh
    TQ = _pick_query_tile(S)

    # Host-side re-blocking (layout plumbing, done once): per-head-group bf16
    # weight slabs; biases stay f32 (added to the f32 accumulations).
    def block_w(w):                              # (E, E) -> (HG, E, G*Dh)
        return w.reshape(E, HG, GD).transpose(1, 0, 2)

    def block_b(b):                              # (1, E) -> (HG, 1, G*Dh)
        return b.reshape(HG, 1, GD)

    wqkv = jnp.stack([block_w(params["wq"]), block_w(params["wk"]),
                      block_w(params["wv"])], axis=1).astype(jnp.bfloat16)  # (HG,3,E,GD)
    bqkv = jnp.stack([block_b(params["bq"]), block_b(params["bk"]),
                      block_b(params["bv"])], axis=1)                       # (HG,3,1,GD)
    wo = params["wo"].reshape(HG, GD, E).astype(jnp.bfloat16)               # (HG,GD,E)
    bo = params["bo"]                                                       # (1,E) f32

    # bf16 activations: halves HBM->VMEM traffic, MXU-native input dtype.
    xq = query.astype(jnp.bfloat16)
    xk = key.astype(jnp.bfloat16)
    xv = value.astype(jnp.bfloat16)

    xq_spec = pl.BlockSpec((1, TQ, E), lambda b, qi, hg: (b, qi, 0))
    xkv_spec = pl.BlockSpec((1, S, E), lambda b, qi, hg: (b, 0, 0))
    wqkv_spec = pl.BlockSpec((1, 3, E, GD), lambda b, qi, hg: (hg, 0, 0, 0))
    bqkv_spec = pl.BlockSpec((1, 3, 1, GD), lambda b, qi, hg: (hg, 0, 0, 0))
    wo_spec = pl.BlockSpec((1, GD, E), lambda b, qi, hg: (hg, 0, 0))
    bo_spec = pl.BlockSpec((1, E), lambda b, qi, hg: (0, 0))
    out_spec = pl.BlockSpec((1, TQ, E), lambda b, qi, hg: (b, qi, 0))

    kernel = functools.partial(mha_kernel, scale=1.0 / math.sqrt(Dh),
                               heads_per_step=G, head_dim=Dh)

    return pl.pallas_call(
        kernel,
        out_shape=jax.ShapeDtypeStruct((B, S, E), jnp.float32),
        grid_spec=pltpu.PrefetchScalarGridSpec(
            num_scalar_prefetch=0,
            grid=(B, S // TQ, HG),                # reduction (head-group) axis last
            in_specs=[xq_spec, xkv_spec, xkv_spec,
                      wqkv_spec, bqkv_spec, wo_spec, bo_spec],
            out_specs=out_spec,
        ),
        compiler_params=pltpu.CompilerParams(
            dimension_semantics=("parallel", "parallel", "arbitrary"),
            vmem_limit_bytes=64 * 1024 * 1024),
    )(xq, xk, xv, wqkv, bqkv, wo, bo)


def reference_mha(query, key, value, params, *, num_heads):
    """Plain-JAX f32 reference mirroring the PyTorch forward."""
    B, S, E = query.shape
    Dh = E // num_heads

    def proj(x, w, b):
        return x @ w + b[0]

    q = proj(query, params["wq"], params["bq"]).reshape(B, S, num_heads, Dh).transpose(0, 2, 1, 3)
    k = proj(key, params["wk"], params["bk"]).reshape(B, S, num_heads, Dh).transpose(0, 2, 1, 3)
    v = proj(value, params["wv"], params["bv"]).reshape(B, S, num_heads, Dh).transpose(0, 2, 1, 3)

    scores = jnp.einsum("bhqd,bhkd->bhqk", q, k) / math.sqrt(Dh)
    attn = jax.nn.softmax(scores, axis=-1)
    out = jnp.einsum("bhqk,bhkd->bhqd", attn, v)
    out = out.transpose(0, 2, 1, 3).reshape(B, S, E)
    return out @ params["wo"] + params["bo"][0]


def init_params(key, embed_dim):
    """Deterministic init (uniform +-1/sqrt(E), like nn.Linear default)."""
    bound = 1.0 / math.sqrt(embed_dim)
    keys = jax.random.split(key, 8)

    def u(k, shape):
        return jax.random.uniform(k, shape, jnp.float32, -bound, bound)

    return {
        "wq": u(keys[0], (embed_dim, embed_dim)), "bq": u(keys[1], (1, embed_dim)),
        "wk": u(keys[2], (embed_dim, embed_dim)), "bk": u(keys[3], (1, embed_dim)),
        "wv": u(keys[4], (embed_dim, embed_dim)), "bv": u(keys[5], (1, embed_dim)),
        "wo": u(keys[6], (embed_dim, embed_dim)), "bo": u(keys[7], (1, embed_dim)),
    }


if __name__ == "__main__":
    B, S, E, H = 2, 8, 32, 4

    root = jax.random.PRNGKey(0)
    k_p, k_q, k_k, k_v = jax.random.split(root, 4)

    params = init_params(k_p, E)
    query = jax.random.normal(k_q, (B, S, E), jnp.float32)
    key_ = jax.random.normal(k_k, (B, S, E), jnp.float32)
    value = jax.random.normal(k_v, (B, S, E), jnp.float32)

    out = multi_head_attention(query, key_, value, params, num_heads=H)
    out = jax.block_until_ready(out)

    ref = reference_mha(query, key_, value, params, num_heads=H)
    assert out.shape == (B, S, E)
    # bf16 MXU inputs + approx reciprocal -> bf16-class tolerance vs f32 ref.
    np.testing.assert_allclose(np.asarray(out), np.asarray(ref), rtol=2e-2, atol=2e-2)

    print("KERNEL_OK")
</pallas_src>

<mosaic_0001>
module attributes {stable_mosaic.version = 11 : i64} {
  func.func @mha_kernel(%arg0: i32, %arg1: i32, %arg2: i32, %arg3: memref<1x8x32xbf16, #tpu.memory_space<vmem>>, %arg4: memref<1x8x32xbf16, #tpu.memory_space<vmem>>, %arg5: memref<1x8x32xbf16, #tpu.memory_space<vmem>>, %arg6: memref<1x3x32x32xbf16, #tpu.memory_space<vmem>>, %arg7: memref<1x3x1x32xf32, #tpu.memory_space<vmem>>, %arg8: memref<1x32x32xbf16, #tpu.memory_space<vmem>>, %arg9: memref<1x32xf32, #tpu.memory_space<vmem>>, %arg10: memref<1x8x32xf32, #tpu.memory_space<vmem>>) attributes {dimension_semantics = [#tpu.dimension_semantics<parallel>, #tpu.dimension_semantics<parallel>, #tpu.dimension_semantics<arbitrary>], iteration_bounds = array<i64: 2, 1, 1>, scalar_prefetch = 0 : i64, scratch_operands = 0 : i64, tpu.core_type = #tpu.core_type<tc>, window_params = [{transform_indices = @transform_0, window_bounds = array<i64: 1, 8, 32>}, {transform_indices = @transform_1, window_bounds = array<i64: 1, 8, 32>}, {transform_indices = @transform_2, window_bounds = array<i64: 1, 8, 32>}, {transform_indices = @transform_3, window_bounds = array<i64: 1, 3, 32, 32>}, {transform_indices = @transform_4, window_bounds = array<i64: 1, 3, 1, 32>}, {transform_indices = @transform_5, window_bounds = array<i64: 1, 32, 32>}, {pipeline_mode = #tpu.pipeline_mode<synchronous>, transform_indices = @transform_6, window_bounds = array<i64: 1, 32>}, {transform_indices = @transform_7, window_bounds = array<i64: 1, 8, 32>}]} {
    %c0_i32 = arith.constant 0 : i32
    %0 = arith.cmpi eq, %arg2, %c0_i32 : i32
    %1 = arith.extui %0 : i1 to i32
    %c0_i32_0 = arith.constant 0 : i32
    %2 = arith.cmpi ne, %1, %c0_i32_0 : i32
    scf.if %2 {
      %cst_62 = arith.constant 0.000000e+00 : f32
      %113 = vector.broadcast %cst_62 : f32 to vector<1x8x32xf32>
      %c0_63 = arith.constant 0 : index
      %c0_64 = arith.constant 0 : index
      %c0_65 = arith.constant 0 : index
      %114 = vector.load %arg10[%c0_63, %c0_64, %c0_65] : memref<1x8x32xf32, #tpu.memory_space<vmem>>, vector<1x8x32xf32>
      tpu.vector_store %arg10[%c0_63, %c0_64, %c0_65], %113 {strides = array<i32>} : memref<1x8x32xf32, #tpu.memory_space<vmem>>, vector<1x8x32xf32>,
    } else {
    }
    %c0 = arith.constant 0 : index
    %c0_1 = arith.constant 0 : index
    %c0_2 = arith.constant 0 : index
    %3 = vector.load %arg3[%c0, %c0_1, %c0_2] : memref<1x8x32xbf16, #tpu.memory_space<vmem>>, vector<1x8x32xbf16>
    %4 = vector.shape_cast %3 : vector<1x8x32xbf16> to vector<8x32xbf16>
    %c0_3 = arith.constant 0 : index
    %c0_4 = arith.constant 0 : index
    %c0_5 = arith.constant 0 : index
    %5 = vector.load %arg4[%c0_3, %c0_4, %c0_5] : memref<1x8x32xbf16, #tpu.memory_space<vmem>>, vector<1x8x32xbf16>
    %6 = vector.shape_cast %5 : vector<1x8x32xbf16> to vector<8x32xbf16>
    %c0_6 = arith.constant 0 : index
    %c0_7 = arith.constant 0 : index
    %c0_8 = arith.constant 0 : index
    %7 = vector.load %arg5[%c0_6, %c0_7, %c0_8] : memref<1x8x32xbf16, #tpu.memory_space<vmem>>, vector<1x8x32xbf16>
    %8 = vector.shape_cast %7 : vector<1x8x32xbf16> to vector<8x32xbf16>
    %c0_9 = arith.constant 0 : index
    %c0_10 = arith.constant 0 : index
    %c0_11 = arith.constant 0 : index
    %c0_12 = arith.constant 0 : index
    %9 = vector.load %arg6[%c0_9, %c0_10, %c0_11, %c0_12] : memref<1x3x32x32xbf16, #tpu.memory_space<vmem>>, vector<1x1x32x32xbf16>
    %10 = vector.shape_cast %9 : vector<1x1x32x32xbf16> to vector<32x32xbf16>
    %c0_13 = arith.constant 0 : index
    %c1 = arith.constant 1 : index
    %c0_14 = arith.constant 0 : index
    %c0_15 = arith.constant 0 : index
    %11 = vector.load %arg6[%c0_13, %c1, %c0_14, %c0_15] : memref<1x3x32x32xbf16, #tpu.memory_space<vmem>>, vector<1x1x32x32xbf16>
    %12 = vector.shape_cast %11 : vector<1x1x32x32xbf16> to vector<32x32xbf16>
    %c0_16 = arith.constant 0 : index
    %c2 = arith.constant 2 : index
    %c0_17 = arith.constant 0 : index
    %c0_18 = arith.constant 0 : index
    %13 = vector.load %arg6[%c0_16, %c2, %c0_17, %c0_18] : memref<1x3x32x32xbf16, #tpu.memory_space<vmem>>, vector<1x1x32x32xbf16>
    %14 = vector.shape_cast %13 : vector<1x1x32x32xbf16> to vector<32x32xbf16>
    %c0_19 = arith.constant 0 : index
    %c0_20 = arith.constant 0 : index
    %c0_21 = arith.constant 0 : index
    %c0_22 = arith.constant 0 : index
    %15 = vector.load %arg7[%c0_19, %c0_20, %c0_21, %c0_22] : memref<1x3x1x32xf32, #tpu.memory_space<vmem>>, vector<1x1x1x32xf32>
    %16 = vector.shape_cast %15 : vector<1x1x1x32xf32> to vector<1x32xf32>
    %c0_23 = arith.constant 0 : index
    %c1_24 = arith.constant 1 : index
    %c0_25 = arith.constant 0 : index
    %c0_26 = arith.constant 0 : index
    %17 = vector.load %arg7[%c0_23, %c1_24, %c0_25, %c0_26] : memref<1x3x1x32xf32, #tpu.memory_space<vmem>>, vector<1x1x1x32xf32>
    %18 = vector.shape_cast %17 : vector<1x1x1x32xf32> to vector<1x32xf32>
    %c0_27 = arith.constant 0 : index
    %c2_28 = arith.constant 2 : index
    %c0_29 = arith.constant 0 : index
    %c0_30 = arith.constant 0 : index
    %19 = vector.load %arg7[%c0_27, %c2_28, %c0_29, %c0_30] : memref<1x3x1x32xf32, #tpu.memory_space<vmem>>, vector<1x1x1x32xf32>
    %20 = vector.shape_cast %19 : vector<1x1x1x32xf32> to vector<1x32xf32>
    %c0_31 = arith.constant 0 : index
    %c0_32 = arith.constant 0 : index
    %c0_33 = arith.constant 0 : index
    %21 = vector.load %arg8[%c0_31, %c0_32, %c0_33] : memref<1x32x32xbf16, #tpu.memory_space<vmem>>, vector<1x32x32xbf16>
    %22 = vector.shape_cast %21 : vector<1x32x32xbf16> to vector<32x32xbf16>
    %cst = arith.constant dense<0.000000e+00> : vector<8x32xf32>
    %23 = tpu.matmul %4, %10, %cst {dimension_numbers = #tpu.dot_dimension_numbers<[1], [0], [0], [1], [0, 0, 1, 1], [], []>} : vector<8x32xbf16>, vector<32x32xbf16>, vector<8x32xf32> -> vector<8x32xf32>
    %24 = vector.broadcast %16 : vector<1x32xf32> to vector<8x32xf32>
    %25 = arith.addf %23, %24 : vector<8x32xf32>
    %cst_34 = arith.constant 0.353553385 : f32
    %26 = vector.broadcast %cst_34 : f32 to vector<8x32xf32>
    %27 = arith.mulf %25, %26 : vector<8x32xf32>
    %cst_35 = arith.constant dense<0.000000e+00> : vector<8x32xf32>
    %28 = tpu.matmul %6, %12, %cst_35 {dimension_numbers = #tpu.dot_dimension_numbers<[1], [0], [0], [1], [0, 0, 1, 1], [], []>} : vector<8x32xbf16>, vector<32x32xbf16>, vector<8x32xf32> -> vector<8x32xf32>
    %29 = vector.broadcast %18 : vector<1x32xf32> to vector<8x32xf32>
    %30 = arith.addf %28, %29 : vector<8x32xf32>
    %cst_36 = arith.constant dense<0.000000e+00> : vector<8x32xf32>
    %31 = tpu.matmul %8, %14, %cst_36 {dimension_numbers = #tpu.dot_dimension_numbers<[1], [0], [0], [1], [0, 0, 1, 1], [], []>} : vector<8x32xbf16>, vector<32x32xbf16>, vector<8x32xf32> -> vector<8x32xf32>
    %32 = vector.broadcast %20 : vector<1x32xf32> to vector<8x32xf32>
    %33 = arith.addf %31, %32 : vector<8x32xf32>
    %34 = arith.truncf %27 : vector<8x32xf32> to vector<8x32xbf16>
    %35 = arith.truncf %30 : vector<8x32xf32> to vector<8x32xbf16>
    %36 = arith.truncf %33 : vector<8x32xf32> to vector<8x32xbf16>
    %37 = vector.extract_strided_slice %34 {offsets = [0, 0], sizes = [8, 8], strides = [1, 1]} : vector<8x32xbf16> to vector<8x8xbf16>
    %38 = vector.extract_strided_slice %35 {offsets = [0, 0], sizes = [8, 8], strides = [1, 1]} : vector<8x32xbf16> to vector<8x8xbf16>
    %39 = vector.extract_strided_slice %36 {offsets = [0, 0], sizes = [8, 8], strides = [1, 1]} : vector<8x32xbf16> to vector<8x8xbf16>
    %cst_37 = arith.constant dense<0.000000e+00> : vector<8x8xf32>
    %40 = tpu.matmul %37, %38, %cst_37 {dimension_numbers = #tpu.dot_dimension_numbers<[1], [1], [0], [0], [0, 0, 1, 0], [], []>} : vector<8x8xbf16>, vector<8x8xbf16>, vector<8x8xf32> -> vector<8x8xf32>
    %cst_38 = arith.constant dense<0xFF800000> : vector<8xf32>
    %41 = vector.multi_reduction <maximumf>, %40, %cst_38 [1] : vector<8x8xf32> to vector<8xf32>
    %42 = vector.shape_cast %41 : vector<8xf32> to vector<8x1xf32>
    %43 = vector.broadcast %42 : vector<8x1xf32> to vector<8x8xf32>
    %44 = arith.subf %40, %43 : vector<8x8xf32>
    %45 = math.exp %44 : vector<8x8xf32>
    %cst_39 = arith.constant dense<0.000000e+00> : vector<8xf32>
    %46 = vector.multi_reduction <add>, %45, %cst_39 [1] : vector<8x8xf32> to vector<8xf32>
    %47 = vector.shape_cast %46 : vector<8xf32> to vector<8x1xf32>
    %48 = arith.truncf %45 : vector<8x8xf32> to vector<8x8xbf16>
    %cst_40 = arith.constant dense<0.000000e+00> : vector<8x8xf32>
    %49 = tpu.matmul %48, %39, %cst_40 {dimension_numbers = #tpu.dot_dimension_numbers<[1], [0], [0], [1], [0, 0, 1, 1], [], []>} : vector<8x8xbf16>, vector<8x8xbf16>, vector<8x8xf32> -> vector<8x8xf32>
    %50 = tpu.reciprocal %47 {approx = true} : vector<8x1xf32> -> vector<8x1xf32>
    %51 = vector.broadcast %50 : vector<8x1xf32> to vector<8x8xf32>
    %52 = arith.mulf %49, %51 : vector<8x8xf32>
    %53 = vector.extract_strided_slice %34 {offsets = [0, 8], sizes = [8, 8], strides = [1, 1]} : vector<8x32xbf16> to vector<8x8xbf16>
    %54 = vector.extract_strided_slice %35 {offsets = [0, 8], sizes = [8, 8], strides = [1, 1]} : vector<8x32xbf16> to vector<8x8xbf16>
    %55 = vector.extract_strided_slice %36 {offsets = [0, 8], sizes = [8, 8], strides = [1, 1]} : vector<8x32xbf16> to vector<8x8xbf16>
    %cst_41 = arith.constant dense<0.000000e+00> : vector<8x8xf32>
    %56 = tpu.matmul %53, %54, %cst_41 {dimension_numbers = #tpu.dot_dimension_numbers<[1], [1], [0], [0], [0, 0, 1, 0], [], []>} : vector<8x8xbf16>, vector<8x8xbf16>, vector<8x8xf32> -> vector<8x8xf32>
    %cst_42 = arith.constant dense<0xFF800000> : vector<8xf32>
    %57 = vector.multi_reduction <maximumf>, %56, %cst_42 [1] : vector<8x8xf32> to vector<8xf32>
    %58 = vector.shape_cast %57 : vector<8xf32> to vector<8x1xf32>
    %59 = vector.broadcast %58 : vector<8x1xf32> to vector<8x8xf32>
    %60 = arith.subf %56, %59 : vector<8x8xf32>
    %61 = math.exp %60 : vector<8x8xf32>
    %cst_43 = arith.constant dense<0.000000e+00> : vector<8xf32>
    %62 = vector.multi_reduction <add>, %61, %cst_43 [1] : vector<8x8xf32> to vector<8xf32>
    %63 = vector.shape_cast %62 : vector<8xf32> to vector<8x1xf32>
    %64 = arith.truncf %61 : vector<8x8xf32> to vector<8x8xbf16>
    %cst_44 = arith.constant dense<0.000000e+00> : vector<8x8xf32>
    %65 = tpu.matmul %64, %55, %cst_44 {dimension_numbers = #tpu.dot_dimension_numbers<[1], [0], [0], [1], [0, 0, 1, 1], [], []>} : vector<8x8xbf16>, vector<8x8xbf16>, vector<8x8xf32> -> vector<8x8xf32>
    %66 = tpu.reciprocal %63 {approx = true} : vector<8x1xf32> -> vector<8x1xf32>
    %67 = vector.broadcast %66 : vector<8x1xf32> to vector<8x8xf32>
    %68 = arith.mulf %65, %67 : vector<8x8xf32>
    %69 = vector.extract_strided_slice %34 {offsets = [0, 16], sizes = [8, 8], strides = [1, 1]} : vector<8x32xbf16> to vector<8x8xbf16>
    %70 = vector.extract_strided_slice %35 {offsets = [0, 16], sizes = [8, 8], strides = [1, 1]} : vector<8x32xbf16> to vector<8x8xbf16>
    %71 = vector.extract_strided_slice %36 {offsets = [0, 16], sizes = [8, 8], strides = [1, 1]} : vector<8x32xbf16> to vector<8x8xbf16>
    %cst_45 = arith.constant dense<0.000000e+00> : vector<8x8xf32>
    %72 = tpu.matmul %69, %70, %cst_45 {dimension_numbers = #tpu.dot_dimension_numbers<[1], [1], [0], [0], [0, 0, 1, 0], [], []>} : vector<8x8xbf16>, vector<8x8xbf16>, vector<8x8xf32> -> vector<8x8xf32>
    %cst_46 = arith.constant dense<0xFF800000> : vector<8xf32>
    %73 = vector.multi_reduction <maximumf>, %72, %cst_46 [1] : vector<8x8xf32> to vector<8xf32>
    %74 = vector.shape_cast %73 : vector<8xf32> to vector<8x1xf32>
    %75 = vector.broadcast %74 : vector<8x1xf32> to vector<8x8xf32>
    %76 = arith.subf %72, %75 : vector<8x8xf32>
    %77 = math.exp %76 : vector<8x8xf32>
    %cst_47 = arith.constant dense<0.000000e+00> : vector<8xf32>
    %78 = vector.multi_reduction <add>, %77, %cst_47 [1] : vector<8x8xf32> to vector<8xf32>
    %79 = vector.shape_cast %78 : vector<8xf32> to vector<8x1xf32>
    %80 = arith.truncf %77 : vector<8x8xf32> to vector<8x8xbf16>
    %cst_48 = arith.constant dense<0.000000e+00> : vector<8x8xf32>
    %81 = tpu.matmul %80, %71, %cst_48 {dimension_numbers = #tpu.dot_dimension_numbers<[1], [0], [0], [1], [0, 0, 1, 1], [], []>} : vector<8x8xbf16>, vector<8x8xbf16>, vector<8x8xf32> -> vector<8x8xf32>
    %82 = tpu.reciprocal %79 {approx = true} : vector<8x1xf32> -> vector<8x1xf32>
    %83 = vector.broadcast %82 : vector<8x1xf32> to vector<8x8xf32>
    %84 = arith.mulf %81, %83 : vector<8x8xf32>
    %85 = vector.extract_strided_slice %34 {offsets = [0, 24], sizes = [8, 8], strides = [1, 1]} : vector<8x32xbf16> to vector<8x8xbf16>
    %86 = vector.extract_strided_slice %35 {offsets = [0, 24], sizes = [8, 8], strides = [1, 1]} : vector<8x32xbf16> to vector<8x8xbf16>
    %87 = vector.extract_strided_slice %36 {offsets = [0, 24], sizes = [8, 8], strides = [1, 1]} : vector<8x32xbf16> to vector<8x8xbf16>
    %cst_49 = arith.constant dense<0.000000e+00> : vector<8x8xf32>
    %88 = tpu.matmul %85, %86, %cst_49 {dimension_numbers = #tpu.dot_dimension_numbers<[1], [1], [0], [0], [0, 0, 1, 0], [], []>} : vector<8x8xbf16>, vector<8x8xbf16>, vector<8x8xf32> -> vector<8x8xf32>
    %cst_50 = arith.constant dense<0xFF800000> : vector<8xf32>
    %89 = vector.multi_reduction <maximumf>, %88, %cst_50 [1] : vector<8x8xf32> to vector<8xf32>
    %90 = vector.shape_cast %89 : vector<8xf32> to vector<8x1xf32>
    %91 = vector.broadcast %90 : vector<8x1xf32> to vector<8x8xf32>
    %92 = arith.subf %88, %91 : vector<8x8xf32>
    %93 = math.exp %92 : vector<8x8xf32>
    %cst_51 = arith.constant dense<0.000000e+00> : vector<8xf32>
    %94 = vector.multi_reduction <add>, %93, %cst_51 [1] : vector<8x8xf32> to vector<8xf32>
    %95 = vector.shape_cast %94 : vector<8xf32> to vector<8x1xf32>
    %96 = arith.truncf %93 : vector<8x8xf32> to vector<8x8xbf16>
    %cst_52 = arith.constant dense<0.000000e+00> : vector<8x8xf32>
    %97 = tpu.matmul %96, %87, %cst_52 {dimension_numbers = #tpu.dot_dimension_numbers<[1], [0], [0], [1], [0, 0, 1, 1], [], []>} : vector<8x8xbf16>, vector<8x8xbf16>, vector<8x8xf32> -> vector<8x8xf32>
    %98 = tpu.reciprocal %95 {approx = true} : vector<8x1xf32> -> vector<8x1xf32>
    %99 = vector.broadcast %98 : vector<8x1xf32> to vector<8x8xf32>
    %100 = arith.mulf %97, %99 : vector<8x8xf32>
    %101 = tpu.concatenate %52, %68, %84, %100 in 1 : vector<8x8xf32>, vector<8x8xf32>, vector<8x8xf32>, vector<8x8xf32> -> vector<8x32xf32>
    %c0_53 = arith.constant 0 : index
    %c0_54 = arith.constant 0 : index
    %c0_55 = arith.constant 0 : index
    %102 = vector.load %arg10[%c0_53, %c0_54, %c0_55] : memref<1x8x32xf32, #tpu.memory_space<vmem>>, vector<1x8x32xf32>
    %103 = vector.shape_cast %102 : vector<1x8x32xf32> to vector<8x32xf32>
    %104 = arith.truncf %101 : vector<8x32xf32> to vector<8x32xbf16>
    %cst_56 = arith.constant dense<0.000000e+00> : vector<8x32xf32>
    %105 = tpu.matmul %104, %22, %cst_56 {dimension_numbers = #tpu.dot_dimension_numbers<[1], [0], [0], [1], [0, 0, 1, 1], [], []>} : vector<8x32xbf16>, vector<32x32xbf16>, vector<8x32xf32> -> vector<8x32xf32>
    %106 = arith.addf %103, %105 : vector<8x32xf32>
    %c0_57 = arith.constant 0 : index
    %c0_58 = arith.constant 0 : index
    %c0_59 = arith.constant 0 : index
    %107 = vector.load %arg10[%c0_57, %c0_58, %c0_59] : memref<1x8x32xf32, #tpu.memory_space<vmem>>, vector<1x8x32xf32>
    %108 = vector.shape_cast %107 : vector<1x8x32xf32> to vector<8x32xf32>
    %109 = vector.shape_cast %106 : vector<8x32xf32> to vector<1x8x32xf32>
    tpu.vector_store %arg10[%c0_57, %c0_58, %c0_59], %109 {strides = array<i32>} : memref<1x8x32xf32, #tpu.memory_space<vmem>>, vector<1x8x32xf32>,
    %c0_i32_60 = arith.constant 0 : i32
    %110 = arith.cmpi eq, %arg2, %c0_i32_60 : i32
    %111 = arith.extui %110 : i1 to i32
    %c0_i32_61 = arith.constant 0 : i32
    %112 = arith.cmpi ne, %111, %c0_i32_61 : i32
    scf.if %112 {
      %c0_62 = arith.constant 0 : index
      %c0_63 = arith.constant 0 : index
      %c0_64 = arith.constant 0 : index
      %113 = vector.load %arg10[%c0_62, %c0_63, %c0_64] : memref<1x8x32xf32, #tpu.memory_space<vmem>>, vector<1x8x32xf32>
      %114 = vector.shape_cast %113 : vector<1x8x32xf32> to vector<8x32xf32>
      %c0_65 = arith.constant 0 : index
      %c0_66 = arith.constant 0 : index
      %115 = vector.load %arg9[%c0_65, %c0_66] : memref<1x32xf32, #tpu.memory_space<vmem>>, vector<1x32xf32>
      %116 = vector.broadcast %115 : vector<1x32xf32> to vector<8x32xf32>
      %117 = arith.addf %114, %116 : vector<8x32xf32>
      %c0_67 = arith.constant 0 : index
      %c0_68 = arith.constant 0 : index
      %c0_69 = arith.constant 0 : index
      %118 = vector.load %arg10[%c0_67, %c0_68, %c0_69] : memref<1x8x32xf32, #tpu.memory_space<vmem>>, vector<1x8x32xf32>
      %119 = vector.shape_cast %118 : vector<1x8x32xf32> to vector<8x32xf32>
      %120 = vector.shape_cast %117 : vector<8x32xf32> to vector<1x8x32xf32>
      tpu.vector_store %arg10[%c0_67, %c0_68, %c0_69], %120 {strides = array<i32>} : memref<1x8x32xf32, #tpu.memory_space<vmem>>, vector<1x8x32xf32>,
    } else {
    }
    return
  }
  func.func @transform_0(%arg0: i32, %arg1: i32, %arg2: i32) -> (i32, i32, i32) {
    %c0_i32 = arith.constant 0 : i32
    %c0_i32_0 = arith.constant 0 : i32
    return %arg0, %arg1, %c0_i32 : i32, i32, i32
  }
  func.func @transform_1(%arg0: i32, %arg1: i32, %arg2: i32) -> (i32, i32, i32) {
    %c0_i32 = arith.constant 0 : i32
    %c0_i32_0 = arith.constant 0 : i32
    %c0_i32_1 = arith.constant 0 : i32
    return %arg0, %c0_i32, %c0_i32_0 : i32, i32, i32
  }
  func.func @transform_2(%arg0: i32, %arg1: i32, %arg2: i32) -> (i32, i32, i32) {
    %c0_i32 = arith.constant 0 : i32
    %c0_i32_0 = arith.constant 0 : i32
    %c0_i32_1 = arith.constant 0 : i32
    return %arg0, %c0_i32, %c0_i32_0 : i32, i32, i32
  }
  func.func @transform_3(%arg0: i32, %arg1: i32, %arg2: i32) -> (i32, i32, i32, i32) {
    %c0_i32 = arith.constant 0 : i32
    %c0_i32_0 = arith.constant 0 : i32
    %c0_i32_1 = arith.constant 0 : i32
    %c0_i32_2 = arith.constant 0 : i32
    return %arg2, %c0_i32, %c0_i32_0, %c0_i32_1 : i32, i32, i32, i32
  }
  func.func @transform_4(%arg0: i32, %arg1: i32, %arg2: i32) -> (i32, i32, i32, i32) {
    %c0_i32 = arith.constant 0 : i32
    %c0_i32_0 = arith.constant 0 : i32
    %c0_i32_1 = arith.constant 0 : i32
    %c0_i32_2 = arith.constant 0 : i32
    return %arg2, %c0_i32, %c0_i32_0, %c0_i32_1 : i32, i32, i32, i32
  }
  func.func @transform_5(%arg0: i32, %arg1: i32, %arg2: i32) -> (i32, i32, i32) {
    %c0_i32 = arith.constant 0 : i32
    %c0_i32_0 = arith.constant 0 : i32
    %c0_i32_1 = arith.constant 0 : i32
    return %arg2, %c0_i32, %c0_i32_0 : i32, i32, i32
  }
  func.func @transform_6(%arg0: i32, %arg1: i32, %arg2: i32) -> (i32, i32) {
    %c0_i32 = arith.constant 0 : i32
    %c0_i32_0 = arith.constant 0 : i32
    %c0_i32_1 = arith.constant 0 : i32
    return %c0_i32, %c0_i32_0 : i32, i32
  }
  func.func @transform_7(%arg0: i32, %arg1: i32, %arg2: i32) -> (i32, i32, i32) {
    %c0_i32 = arith.constant 0 : i32
    %c0_i32_0 = arith.constant 0 : i32
    return %arg0, %arg1, %c0_i32 : i32, i32, i32
  }
}

</mosaic_0001>

<bundles_post_ra>
// kernel: tpu_custom_call.1
= control target key start
LH: loop header
LB: loop body
LE: loop exit
PB: predicated region body
PF: predicated region fallthrough
CT: control target
= control target key end

     0   :  { %s1808_s0 = inlined_call_operand.hbm [shape: bf16[2,8,32], index: 0, kind: input, shape index: {}]   ;;  %s1809_s1 = inlined_call_operand.hbm [shape: bf16[2,8,32], index: 1, kind: input, shape index: {}]   ;;  %s1810_s2 = inlined_call_operand.hbm [shape: bf16[2,8,32], index: 2, kind: input, shape index: {}]   ;;  %s1811_s3 = inlined_call_operand.hbm [shape: bf16[1,3,32,32], index: 3, kind: input, shape index: {}]   ;;  %s1812_s4 = inlined_call_operand.vmem [shape: f32[1,3,1,32], index: 4, kind: input, shape index: {}]   ;;  %s1813_s5 = inlined_call_operand.hbm [shape: bf16[1,32,32], index: 5, kind: input, shape index: {}]   ;;  %s1814_s6 = inlined_call_operand.vmem [shape: f32[1,32], index: 6, kind: input, shape index: {}]   ;;  %s1815_s7 = inlined_call_operand.hbm [shape: f32[2,8,32], index: 7, kind: output, shape index: {}]  }
   0x1   :  { %1827 = sst [smem:[#allocation24_spill]] %s1809_s1 }
   0x2   :  { %1828 = sst [smem:[#allocation25_spill]] %s1811_s3 }
   0x3   :  { %1829 = sst [smem:[#allocation26_spill]] %s1813_s5 }
   0x4   :  { %1830 = sst [smem:[#allocation27_spill]] %s1814_s6 }
   0x5   :  { %12 = vsyncpa [#allocation3], 0 }
   0x6   :  { %14 = vsyncpa [#allocation3 + $0x1], 0 }
   0x7   :  { %15 = vsyncpa [#allocation6], 0 }
   0x8   :  { %17 = vsyncpa [#allocation6 + $0x1], 0 }
   0x9   :  { %18 = vsyncpa [#allocation9], 0 }
   0xa   :  { %19 = vsyncpa [#allocation4], 0 }
   0xb   :  { %21 = vsyncpa [#allocation4 + $0x1], 0  ;;  %s1554_s24 = smov 0   ;;  %s1556_s25 = smov 0  }
   0xc   :  { %s1558_s26 = smov 0   ;;  %s1560_s27 = smov 0  }
   0xd   :  { %s1562_s28 = smov 0   ;;  %s1564_s29 = smov 0  }
   0xe LB: > { %1831 = sst [smem:[#allocation16_spill]] %s1481_s24  ;;  %s1585_s30 = sadd.s32 4294967295, %s1501_s29   ;;  %s1501_s29 = sphi %s1564_s29, %s27_s29   ;;  %s1497_s28 = sphi %s1562_s28, %s1860_s28   ;;  %s1493_s27 = sphi %s1560_s27, %s1859_s27   ;;  %s1489_s26 = sphi %s1558_s26, %s1858_s26   ;;  %s1485_s25 = sphi %s1556_s25, %s1862_s25   ;;  %s1481_s24 = sphi %s1554_s24, %s1861_s24  }
   0xf   : > { %1832 = sst [smem:[#allocation17_spill]] %s1489_s26  ;;  %p1063_p0 = scmp.ge.s32.totalorder %s1501_s29, 1 }
  0x10   : > { %1833 = sst [smem:[#allocation18_spill]] %s1497_s28  ;;  %p69_p1 = scmp.eq.s32.totalorder %s1585_s30, 0 }
  0x11   : > { %1834 = sst [smem:[#allocation19_spill]] %s1501_s29  ;;  %p258_p2 = scmp.lt.s32.totalorder %s1501_s29, 3 }
  0x12   : > { %s1835_s3 = sld [smem:[#allocation25_spill]]  ;;  %s1503_s12 = smov [#allocation8]  }
  0x13   : > { %p1593_p3 = pnand %p1063_p0, %p258_p2  ;;  %s274_s13 = sshll.u32 %s1503_s12, 4  ;;  %s275_s13 = int_to_ptr.vmem [resolvable:$true] %s274_s13 }
  0x14   : > { %s1816_s15 = smov 64   ;;  %s1817_s16 = smov 4  }
  0x15   : > { %p1155_p4 = pneg %p1593_p3  ;;  %s1062_s17 = sadd.s32 4294967294, %s1501_s29  }
  0x16   : > { %s46_s18 = sadd.s32 1, %s1497_s28  ;;  %s55_s19 = sadd.s32 1, %s1489_s26 }
  0x17   : > { %p1601_p5 = pnand %p1155_p4, %p69_p1  ;;  %p48_p7 = scmp.ge.s32.totalorder %s46_s18, 2 }
  0x18   : > { %s272_s10 = sshll.u32 %s1835_s3, 4  ;;  %p62_p8 = scmp.ne.s32.totalorder %s1489_s26, %s1485_s25  ;;  %s273_s10 = int_to_ptr.hbm [resolvable:$true] %s272_s10 }
  0x19   : > { %1158 = dma.hbm_to_vmem [thread:$0]  (!%p1601_p5), %s273_s10, 768, %s275_s13, [#allocation9], %s1816_s15, %s1816_s15, %s1817_s16  }
  0x1a   : > { %p63_p9 = scmp.eq.s32.totalorder %s1501_s29, 0  ;;  %p68_p10 = scmp.ne.s32.totalorder %s1485_s25, %s1481_s24 }
  0x1b   : > { %s1864_s18 = smov (%p48_p7, %s46_s18), 0  ;;  %p245_p13 = scmp.eq.s32.totalorder %s1585_s30, 1 }
  0x1c   : > { %1838 = sst [smem:[#allocation20_spill]] %s1864_s18  ;;  %p1621_p11 = por %p63_p9, %p62_p8 }
  0x1d   : > { %p1627_p12 = por %p69_p1, %p68_p10  ;;  %s50_s22 = ssub.s32 %s1497_s28, %s1864_s18 }
  0x1e   : > { %p53_p0 = scmp.eq.s32.totalorder %s50_s22, 0  ;;  %p251_p2 = scmp.eq.s32.totalorder %s1062_s17, 1 }
  0x1f   : > { %p1634_p4 = por %p245_p13, %p62_p8  ;;  %p1178_p7 = scmp.lt.s32.totalorder %s1501_s29, 2 }
  0x20   : > { %s1640_s8 = scalar_select %p53_p0, %s1489_s26, %s55_s19  }
  0x21   : > { %s1841_s23 = scalar_select %p1634_p4, 1, 0 }
  0x22   : > { %1843 = sst [smem:[#allocation22_spill]] %s1640_s8  ;;  %p1642_p9 = por %p251_p2, %p68_p10 }
  0x23   : > { %1842 = sst [smem:[#allocation21_spill]] %s1841_s23  ;;  %s315_s10 = sand.u32 1, %s1489_s26  }
  0x24   : > { %s1844_s9 = scalar_select %p1642_p9, 1, 0 }
  0x25   : > { %s1647_s12 = sshll.u32 %s315_s10, 2  ;;  %s1069_s13 = sshll.u32 %s1497_s28, 2 }
  0x26   : > { %1845 = sst [smem:[#allocation23_spill]] %s1844_s9  ;;  %p1652_p6 = pnand %p1178_p7, %p1621_p11 }
  0x27   : > { %s335_s22 = sand.u32 1, %s1501_s29   ;;  %s1847_s1 = sld [smem:[#allocation24_spill]] }
  0x28   : > { %s339_s18 = scalar_lea.vmem [#allocation5], %s1647_s12  ;;  %s336_s28 = scalar_lea.sflag [#allocation6], %s335_s22 }
  0x29   : > { %s347_s8 = sshll.u32 %s339_s18, 4  ;;  %s1848_s5 = sld [smem:[#allocation26_spill]]  ;;  %s348_s8 = int_to_ptr.vmem [resolvable:$true] %s347_s8 }
  0x2a   : > { %s1506_s29 = smov [#allocation10]   ;;  %s1849_s15 = smov 4  }
  0x2b   : > { %s298_s24 = sshll.u32 %s1506_s29, 4  ;;  %s324_s22 = scalar_lea.hbm %s1808_s0, %s1069_s13  ;;  %s299_s24 = int_to_ptr.vmem [resolvable:$true] %s298_s24 }
  0x2c   : > { %s316_s26 = scalar_lea.sflag [#allocation3], %s315_s10  ;;  %s362_s14 = scalar_lea.hbm %s1810_s2, %s1069_s13 }
  0x2d   : > { %s343_s16 = scalar_lea.hbm %s1847_s1, %s1069_s13  ;;  %s358_s6 = scalar_lea.vmem [#allocation7], %s1647_s12 }
  0x2e   : > { %s345_s3 = sshll.u32 %s343_s16, 4  ;;  %s1850_s16 = smov 64   ;;  %s346_s3 = int_to_ptr.hbm [resolvable:$true] %s345_s3 }
  0x2f   : > { %1168 = dma.hbm_to_vmem [thread:$0]  (!%p1652_p6), %s346_s3, 64, %s348_s8, %s336_s28  }
  0x30   : > { %s296_s9 = sshll.u32 %s1848_s5, 4  ;;  %s326_s3 = sshll.u32 %s324_s22, 4  ;;  %s297_s9 = int_to_ptr.hbm [resolvable:$true] %s296_s9  ;;  %s327_s3 = int_to_ptr.hbm [resolvable:$true] %s326_s3 }
  0x31   : > { %1161 = dma.hbm_to_vmem [thread:$0]  (!%p1601_p5), %s297_s9, 256, %s299_s24, [#allocation9], %s1850_s16, %s1850_s16, %s1849_s15  }
  0x32   : > { %s319_s8 = scalar_lea.vmem [#allocation2], %s1647_s12  ;;  %s364_s5 = sshll.u32 %s362_s14, 4  ;;  %s365_s5 = int_to_ptr.hbm [resolvable:$true] %s364_s5 }
  0x33   : > { %s328_s1 = sshll.u32 %s319_s8, 4  ;;  %s366_s23 = sshll.u32 %s358_s6, 4  ;;  %s329_s1 = int_to_ptr.vmem [resolvable:$true] %s328_s1  ;;  %s367_s23 = int_to_ptr.vmem [resolvable:$true] %s366_s23 }
  0x34   : > { %1165 = dma.hbm_to_vmem [thread:$0]  (!%p1652_p6), %s327_s3, 64, %s329_s1, %s316_s26  }
  0x35   : > { %1171 = dma.hbm_to_vmem [thread:$0]  (!%p1652_p6), %s365_s5, 64, %s367_s23, %s336_s28  }
  0x36   : > { %375 = sbr.rel (%p1593_p3) target bundleno = 995 (0x3e3), region = 48  ;;  %s1686_s24 = sand.u32 (!%p1593_p3), 1, %s1485_s25  }
  0x37   : > { %s1689_s1 = sshll.u32 (!%p1593_p3), %s1686_s24, 2  ;;  %s378_s9 = scalar_lea.sflag (!%p1593_p3), [#allocation3], %s1686_s24 }
  0x38   : > { %s381_s10 = scalar_lea.vmem (!%p1593_p3), [#allocation2], %s1689_s1 }
  0x3b   : > { %1464 = dma.done.wait (%p1627_p12), %s378_s9, 64  }
  0x3c   : > { %1466 = vsyncadd (%p1627_p12), %s378_s9, 4294967232  ;;  %s387_s5 = sand.u32 1, %s1585_s30   ;;  %s391_s28 = scalar_lea.vmem [#allocation5], %s1689_s1 }
  0x3d   : > { %s388_s6 = scalar_lea.sflag [#allocation6], %s387_s5 }
  0x3e   : > { %1468 = dma.done.wait (%p1627_p12), %s388_s6, 128  }
  0x3f   : > { %1470 = vsyncadd (%p1627_p12), %s388_s6, 4294967168  ;;  %s401_s11 = scalar_lea.vmem [#allocation7], %s1689_s1 }
  0x40   : > { %1472 = dma.done.wait (%p69_p1), [#allocation9], 1024  }
  0x41   : > { %1474 = vsyncadd (%p69_p1), [#allocation9], 4294966272  ;;  %v1132_v0 = vld [vmem:[#allocation8 + $0x8] sm:$0xff]  ;;  %v1134_v1 = vld [vmem:[#allocation8 + $0x18] sm:$0xff]  ;;  %vm466_vm0 = vcmask 261120   ;;  %vm592_vm1 = vcmask 64512  }
  0x42   : > { %v1131_v2 = vld [vmem:[#allocation8] sm:$0xff]  ;;  %519 = vmatpush.bf16.msra.mxu0 %v1132_v0  ;;  %551 = vmatpush.bf16.msra.mxu1 %v1134_v1  ;;  %v1133_v3 = vld [vmem:[#allocation8 + $0x10] sm:$0xff]  ;;  %v468_v4 = vld [vmem:[%s381_s10] sm:$0xf]  ;;  %s1507_s13 = smov 112   ;;  %s1508_s17 = smov 120  }
  0x43   : > { %v469_v5 = vld [vmem:[%s391_s28] sm:$0xf]  ;;  %v1136_v6 = vld [vmem:[#allocation8 + $0x28] sm:$0xff]  ;;  %v1135_v7 = vld [vmem:[#allocation8 + $0x20] sm:$0xff]  ;;  %s1509_s15 = smov 104   ;;  %vm625_vm2 = vcmask 1043456  }
  0x44   : > { %582 = vmatpush.bf16.msra.mxu2 %v1136_v6  ;;  %v470_v8 = vld [vmem:[%s401_s11] sm:$0xf]  ;;  %v1241_v9 = vld [vmem:[%s1812_s4] ss:$0 sm:$0xff]  ;;  %v1242_v10 = vld [vmem:[%s1812_s4 + $0x1] ss:$0 sm:$0xff] }
  0x45   : > { %v1243_v29 = vld [vmem:[%s1812_s4 + $0x2] ss:$0 sm:$0xff]  ;;  %s1510_s19 = smov 8   ;;  %s1511_s22 = smov 16   ;;  %vm834_vm3 = vcmask 130048   ;;  %vm836_vm4 = vcmask 195584  }
  0x46   : > { %520 = vmatpush.bf16.msra.mxu0 %v1131_v2  ;;  %552 = vmatpush.bf16.msra.mxu1 %v1133_v3  ;;  %s1512_s3 = smov 24   ;;  %s1080_s8 = sshll.u32 %s1686_s24, 3 }
  0x47   : > { %s1754_s26 = scalar_lea.vmem [#allocation11], %s1080_s8  ;;  %s1128_s29 = sshll.u32 %s1493_s27, 3 }
  0x48   : > { %583 = vmatpush.bf16.msra.mxu2 %v1135_v7  ;;  %s892_s9 = scalar_lea.hbm %s1815_s7, %s1128_s29  ;;  %s1852_s6 = sld [smem:[#allocation27_spill]] }
  0x49   : > { %1091 = vmatmul.msk.bf16.vlgmr.msra.gmra.mxu0 %vm466_vm0, %v468_v4  ;;  %1100 = vmatmul.msk.bf16.vlgmr.msra.gmra.mxu1 %vm466_vm0, %v469_v5  ;;  %s894_s28 = sshll.u32 %s1754_s26, 4  ;;  %s896_s11 = sshll.u32 %s892_s9, 4  ;;  %s895_s28 = int_to_ptr.vmem [resolvable:$true] %s894_s28  ;;  %s897_s11 = int_to_ptr.hbm [resolvable:$true] %s896_s11 }
  0x4a   : > { %s881_s27 = scalar_lea.sflag [#allocation4], %s1686_s24  ;;  %s1425_s30 = sshra.s32 %s897_s11, 4  ;;  %s1426_s30 = int_to_ptr.hbm [resolvable:$true] %s1425_s30 }
  0x4b   : > { %1109 = vmatmul.msk.bf16.vlgmr.msra.gmra.mxu2 %vm466_vm0, %v470_v8  ;;  %s1427_s21 = scalar_lea.hbm %s1426_s30, 8  ;;  %p1432_p6 = scmp.lt.s32.totalorder %s1426_s30, %s1815_s7 }
  0x4c   : > { %p1428_p1 = scmp.ne.s32.totalorder %s1426_s30, %s1427_s21 }
  0x4e   : > { %p1429_p3 = pnand %p1428_p1, %p1634_p4 }
  0x50   : > { %p1430_p5 = pneg %p1429_p3 }
  0xc6   : > { %v522_v11 = vpop.f32.mrf.mxu0  ;;  %v554_v12 = vpop.f32.mrf.mxu1 }
  0xc7   : > { %v523_v13 = vadd.f32 %v1241_v9, %v522_v11  ;;  %v555_v14 = vadd.f32 %v1242_v10, %v554_v12 }
  0xc9   : > { %v526_v15 = vmul.f32 0.35355338, %v523_v13  ;;  %v590_v16 = vpack.c.bf16 %v555_v14, %v555_v14 }
  0xcb   : > { %v589_v17 = vpack.c.bf16 %v526_v15, %v526_v15  ;;  %v650_v18 = vunpack.c.l.b16 %v590_v16  ;;  %v597_v19 = vsel %vm592_vm1, %v590_v16, 0 }
  0xcc   : > { %606 = vmatpush.bf16.xpose.msra.mxu3 %v597_v19 }
  0xcd   : > { %v645_v20 = vunpack.c.l.b16 %v589_v17  ;;  %v651_v21 = vpack.c.b16 %v650_v18, %v650_v18 }
  0xce   : > { %v524_v22 = vpop.f32.mrf.mxu0  ;;  %v556_v23 = vpop.f32.mrf.mxu1 }
  0xcf   : > { %711 = vrot.lane.b32.xlu1 %v651_v21, %s1507_s13  ;;  %652 = vrot.lane.b32.xlu0 %v651_v21, %s1508_s17  ;;  %v646_v24 = vpack.c.b16 %v645_v20, %v645_v20  ;;  %v585_v30 = vpop.f32.mrf.mxu2 }
  0xd0   : > { %v586_v31 = vadd.f32 %v1243_v29, %v585_v30 }
  0xd1   : > { %709 = vrot.lane.b32.xlu2 %v646_v24, %s1507_s13 }
  0xd2   : > { %v591_v33 = vpack.c.bf16 %v586_v31, %v586_v31 }
  0xd3   : > { %1110 = vmatmul.msk.bf16.vlgmr.msra.gmra.mxu3 %vm592_vm1, %v589_v17 }
  0xd4   : > { %v684_v37 = vunpack.c.l.b16 %v591_v33  ;;  %v627_v38 = vsel %vm625_vm2, %v591_v33, 0 }
  0xd5   : > { %636 = vmatpush.bf16.msrb.mxu0 %v627_v38  ;;  %v1137_v38 = vld [vmem:[#allocation10] sm:$0xff] }
  0xd6   : > { %v685_v39 = vpack.c.b16 %v684_v37, %v684_v37  ;;  %v1138_v37 = vld [vmem:[#allocation10 + $0x8] sm:$0xff] }
  0xd7   : > { %767 = vrot.lane.b32.xlu1 %v651_v21, %s1509_s15  ;;  %647 = vrot.lane.b32.xlu0 %v646_v24, %s1508_s17  ;;  %v587_v40 = vpop.f32.mrf.mxu2 }
  0xd9   : > { %765 = vrot.lane.b32.xlu2 %v646_v24, %s1509_s15 }
  0xe1   : > { %686 = vrot.lane.b32.xlu2 %v685_v39, %s1508_s17 }
 0x12b   : > { %v710_v32 = vpop.permute.xlu2 %709 }
 0x133   : > { %v766_v43 = vpop.permute.xlu2 %765 }
 0x13b   : > { %v687_v53 = vpop.permute.xlu2 %686 }
 0x13c   : > { %v692_v54 = vsel %vm625_vm2, %v687_v53, 0  ;;  %v1244_v53 = vld [vmem:[%s1852_s6] ss:$0 sm:$0xff] }
 0x13d   : > { %701 = vmatpush.bf16.msrb.mxu2 %v692_v54 }
 0x141   : > { %v712_v25 = vpop.permute.xlu1 %711  ;;  %v653_v26 = vpop.permute.xlu0 %652 }
 0x142   : > { %v658_v27 = vsel %vm592_vm1, %v653_v26, 0  ;;  %v717_v28 = vsel %vm592_vm1, %v712_v25, 0 }
 0x143   : > { %667 = vmatpush.bf16.xpose.msrb.mxu1 %v658_v27  ;;  %726 = vmatpush.bf16.xpose.msrb.mxu3 %v717_v28 }
 0x149   : > { %v768_v34 = vpop.permute.xlu1 %767  ;;  %v648_v35 = vpop.permute.xlu0 %647 }
 0x14a   : > { %v773_v36 = vsel %vm592_vm1, %v768_v34, 0  ;;  %1112 = vmatmul.msk.bf16.vlgmr.msrb.gmra.mxu1 %vm592_vm1, %v648_v35  ;;  %1114 = vmatmul.msk.bf16.vlgmr.msrb.gmra.mxu3 %vm592_vm1, %v710_v32 }
 0x14b   : > { %782 = vmatpush.bf16.xpose.msra.mxu1 %v773_v36  ;;  %861 = vmatpush.bf16.msra.mxu3 %v1138_v37 }
 0x14f   : > { %862 = vmatpush.bf16.msra.mxu3 %v1137_v38 }
 0x156   : > { %v608_v41 = vpop.f32.mrf.mxu3 }
 0x157   : > { %v612_v42 = vsel %vm592_vm1, %v608_v41, -inf }
 0x158   : > { %613 = vmax.xlane.f32.xlu1 %v612_v42 }
 0x15a   : > { %1116 = vmatmul.msk.bf16.vlgmr.msra.gmra.mxu1 %vm592_vm1, %v766_v43 }
 0x15e   : > { %v610_v44 = vpop.f32.mrf.mxu3 }
 0x171   : > { %798 = vrot.lane.b32.xlu1 %v685_v39, %s1509_s15 }
 0x1c7   : > { %v669_v45 = vpop.f32.mrf.mxu1 }
 0x1c8   : > { %v673_v46 = vsel %vm592_vm1, %v669_v45, -inf }
 0x1c9   : > { %674 = vmax.xlane.f32.xlu0 %v673_v46 }
 0x1cb   : > { %v614_v47 = vpop.xlane.xlu1 %613 }
 0x1cc   : > { %v615_v48 = vsub.f32 %v608_v41, %v614_v47 }
 0x1cd   : > { %v728_v49 = vpop.f32.mrf.mxu3 }
 0x1ce   : > { %v616_v50 = vmul.f32 1.442695, %v615_v48  ;;  %v732_v52 = vsel %vm592_vm1, %v728_v49, -inf }
 0x1cf   : > { %v671_v51 = vpop.f32.mrf.mxu1 }
 0x1d0   : > { %1245 = vpow2.f32 %v616_v50 }
 0x1d1   : > { %733 = vmax.xlane.f32.xlu0 %v732_v52 }
 0x1d5   : > { %v730_v55 = vpop.f32.mrf.mxu3 }
 0x1d6   : > { %v1246_v56 = vpop.eup %1245 }
 0x1d7   : > { %v784_v57 = vpop.f32.mrf.mxu1  ;;  %v618_v58 = vsel %vm592_vm1, %v1246_v56, 0.0  ;;  %v621_v59 = vpack.c.bf16 %v1246_v56, %v1246_v56 }
 0x1d8   : > { %619 = vadd.xlane.f32.xlu1 %v618_v58  ;;  %v788_v60 = vsel %vm592_vm1, %v784_v57, -inf }
 0x1d9   : > { %789 = vmax.xlane.f32.xlu2 %v788_v60  ;;  %1111 = vmatmul.msk.bf16.vlgmr.msrb.gmra.mxu0 %vm592_vm1, %v621_v59 }
 0x1df   : > { %v786_v61 = vpop.f32.mrf.mxu1 }
 0x1e3   : > { %v799_v62 = vpop.permute.xlu1 %798 }
 0x1e4   : > { %v804_v63 = vsel %vm625_vm2, %v799_v62, 0 }
 0x1e5   : > { %813 = vmatpush.bf16.msra.mxu2 %v804_v63 }
 0x1f1   : > { %742 = vrot.lane.b32.xlu2 %v685_v39, %s1507_s13  ;;  %v1513_v39 = vmov 0.0   ;;  %s1431_s13 = scalar_lea.hbm %s1815_s7, 16 }
 0x1f2   : > { %467 = vst.msk [vmem:[%s1754_s26] sm:$0xff] %vm466_vm0, %v1513_v39  ;;  %p1433_p8 = scmp.lt.s32.totalorder %s1431_s13, %s1427_s21 }
 0x1f4   : > { %p1434_p10 = por %p1433_p8, %p1432_p6 }
 0x1f6   : > { %p1435_p11 = pnand %p1434_p10, %p1430_p5 }
 0x1f9   : > { %v838_v50 = vld [vmem:[%s1754_s26] sm:$0xff] }
 0x23c   : > { %v675_v0 = vpop.xlane.xlu0 %674 }
 0x23d   : > { %v676_v1 = vsub.f32 %v669_v45, %v675_v0 }
 0x23f   : > { %v677_v2 = vmul.f32 1.442695, %v676_v1 }
 0x241   : > { %1247 = vpow2.f32 %v677_v2 }
 0x244   : > { %v734_v3 = vpop.xlane.xlu0 %733 }
 0x245   : > { %v735_v4 = vsub.f32 %v728_v49, %v734_v3 }
 0x247   : > { %v1248_v5 = vpop.eup %1247  ;;  %v736_v6 = vmul.f32 1.442695, %v735_v4 }
 0x248   : > { %v679_v7 = vsel %vm592_vm1, %v1248_v5, 0.0  ;;  %v682_v8 = vpack.c.bf16 %v1248_v5, %v1248_v5 }
 0x249   : > { %1249 = vpow2.f32 %v736_v6  ;;  %680 = vadd.xlane.f32.xlu0 %v679_v7 }
 0x24a   : > { %1113 = vmatmul.msk.bf16.vlgmr.msrb.gmra.mxu2 %vm592_vm1, %v682_v8 }
 0x24b   : > { %v620_v40 = vpop.xlane.xlu1 %619 }
 0x24c   : > { %v790_v9 = vpop.xlane.xlu2 %789 }
 0x24d   : > { %v791_v10 = vsub.f32 %v784_v57, %v790_v9 }
 0x24f   : > { %v1250_v11 = vpop.eup %1249  ;;  %v792_v12 = vmul.f32 1.442695, %v791_v10 }
 0x250   : > { %v738_v13 = vsel %vm592_vm1, %v1250_v11, 0.0  ;;  %v741_v18 = vpack.c.bf16 %v1250_v11, %v1250_v11 }
 0x251   : > { %1251 = vpow2.f32 %v792_v12  ;;  %739 = vadd.xlane.f32.xlu0 %v738_v13 }
 0x254   : > { %v743_v14 = vpop.permute.xlu2 %742 }
 0x255   : > { %v748_v15 = vsel %vm625_vm2, %v743_v14, 0 }
 0x256   : > { %v638_v16 = vpop.f32.mrf.mxu0  ;;  %757 = vmatpush.bf16.msra.mxu0 %v748_v15 }
 0x257   : > { %v1252_v17 = vpop.eup %1251 }
 0x258   : > { %v797_v19 = vpack.c.bf16 %v1252_v17, %v1252_v17  ;;  %v794_v20 = vsel %vm592_vm1, %v1252_v17, 0.0 }
 0x259   : > { %1115 = vmatmul.msk.bf16.vlgmr.msra.gmra.mxu0 %vm592_vm1, %v741_v18  ;;  %795 = vadd.xlane.f32.xlu0 %v794_v20 }
 0x25a   : > { %1117 = vmatmul.msk.bf16.vlgmr.msra.gmra.mxu2 %vm592_vm1, %v797_v19 }
 0x25e   : > { %v640_v21 = vpop.f32.mrf.mxu0 }
 0x2bc   : > { %v681_v22 = vpop.xlane.xlu0 %680 }
 0x2bd   : > { %1253 = vrcp.f32 %v681_v22 }
 0x2c3   : > { %v1254_v24 = vpop.eup %1253 }
 0x2c4   : > { %v740_v23 = vpop.xlane.xlu0 %739 }
 0x2c5   : > { %1255 = vrcp.f32 %v740_v23 }
 0x2cb   : > { %v1256_v29 = vpop.eup %1255 }
 0x2cc   : > { %v796_v27 = vpop.xlane.xlu0 %795 }
 0x2cd   : > { %v703_v25 = vpop.f32.mrf.mxu2  ;;  %1257 = vrcp.f32 %v796_v27 }
 0x2ce   : > { %v708_v26 = vmul.f32 %v1254_v24, %v703_v25  ;;  %1259 = vrcp.f32 %v620_v40 }
 0x2d0   : > { %822 = vrot.lane.b32.xlu2 %v708_v26, %s1510_s19 }
 0x2d3   : > { %v1258_v32 = vpop.eup %1257 }
 0x2d4   : > { %v1260_v42 = vpop.eup %1259 }
 0x2d5   : > { %v705_v28 = vpop.f32.mrf.mxu2  ;;  %v643_v43 = vmul.f32 %v1260_v42, %v638_v16 }
 0x2d6   : > { %v759_v30 = vpop.f32.mrf.mxu0 }
 0x2d7   : > { %v764_v31 = vmul.f32 %v1256_v29, %v759_v30 }
 0x2d9   : > { %826 = vrot.lane.b32.xlu0 %v764_v31, %s1511_s22 }
 0x2dd   : > { %v815_v33 = vpop.f32.mrf.mxu2 }
 0x2de   : > { %v820_v34 = vmul.f32 %v1258_v32, %v815_v33  ;;  %v761_v35 = vpop.f32.mrf.mxu0 }
 0x2e0   : > { %830 = vrot.lane.b32.xlu2 %v820_v34, %s1512_s3 }
 0x2e5   : > { %v817_v36 = vpop.f32.mrf.mxu2 }
 0x32a   : > { %v823_v41 = vpop.permute.xlu2 %822 }
 0x32b   : > { %v833_v44 = vsel %vm592_vm1, %v643_v43, %v823_v41 }
 0x33a   : > { %v831_v46 = vpop.permute.xlu2 %830 }
 0x34b   : > { %v827_v45 = vpop.permute.xlu0 %826 }
 0x34c   : > { %v835_v47 = vsel %vm834_vm3, %v833_v44, %v827_v45 }
 0x34d   : > { %v837_v48 = vsel %vm836_vm4, %v835_v47, %v831_v46 }
 0x34e   : > { %v839_v49 = vpack.c.bf16 %v837_v48, %v837_v48 }
 0x350   : > { %1126 = vmatmul.msk.bf16.vlgmr.msra.gmra.mxu3 %vm466_vm0, %v839_v49 }
 0x3d3   : > { %v864_v51 = vpop.f32.mrf.mxu3 }
 0x3d4   : > { %v868_v52 = vadd.f32 %v864_v51, %v838_v50 }
 0x3d6   : > { %869 = vst.msk [vmem:[%s1754_s26] sm:$0xff] %vm466_vm0, %v868_v52 }
 0x3db   : > { %v866_v54 = vpop.f32.mrf.mxu3 }
 0x3dd   : > { %v873_v55 = vld [vmem:[%s1754_s26] sm:$0xff] }
 0x3de   : > { %v878_v56 = vadd.f32 %v1244_v53, %v873_v55 }
 0x3e0   : > { %879 = vst.msk [vmem:[%s1754_s26] sm:$0xff] %vm466_vm0, %v878_v56 }
 0x3e1   : > { %1438 = shalt.err (!%p1435_p11)
}
 0x3e2   : > { %1153 = dma.vmem_to_hbm [thread:$0]  (%p1634_p4), %s895_s28, 128, %s897_s11, %s881_s27  }
 0x3e3 PF: > { %s1853_s24 = sld [smem:[#allocation16_spill]] }
 0x3e4   : > { %s1855_s18 = sld [smem:[#allocation19_spill]] }
 0x3e9   : > { %s908_s19 = sand.u32 1, %s1853_s24  }
 0x3ea   : > { %p1856_p12 = scmp.ge.s32.totalorder %s1855_s18, 2  ;;  %s909_s22 = scalar_lea.sflag [#allocation4], %s908_s19 }
 0x3ec   : > { %p1173_p13 = pnand %p1856_p12, %p1642_p9 }
 0x3ee   : > { %p1174_p0 = pneg %p1173_p13 }
 0x3f0   : > { %1476 = dma.done.wait (%p1174_p0), %s909_s22, 128  }
 0x3f1   : > { %1478 = vsyncadd (%p1174_p0), %s909_s22, 4294967168  ;;  %s27_s29 = sadd.s32 1, %s1855_s18   ;;  %s1857_s3 = sld [smem:[#allocation17_spill]] }
 0x3f2   : > { %p24_p2 = scmp.ge.s32.totalorder %s27_s29, 4   ;;  %s1858_s26 = sld [smem:[#allocation22_spill]] }
 0x3f3   : > { %s1859_s27 = sld [smem:[#allocation18_spill]]  ;;  %s1861_s24 = smov %s1485_s25 }
 0x3f4   : > { %s1860_s28 = sld [smem:[#allocation20_spill]]  ;;  %26 = sbr.rel (!%p24_p2) target bundleno = 14 (0xe), region = 142 }
 0x3f7   : > { %s1862_s25 = smov %s1857_s3 }
 0x3f9   :  { %915 = vsyncpa [#allocation3], 1 }
 0x3fa   :  { %917 = vsyncpa [#allocation3 + $0x1], 1 }
 0x3fb   :  { %918 = vsyncpa [#allocation6], 1 }
 0x3fc   :  { %920 = vsyncpa [#allocation6 + $0x1], 1 }
 0x3fd   :  { %921 = vsyncpa [#allocation9], 1 }
 0x3fe   :  { %922 = vsyncpa [#allocation4], 1 }
 0x3ff   :  { %924 = vsyncpa [#allocation4 + $0x1], 1 }

</bundles_post_ra>
